<compile_context>
chip_gen: v6e
topology: v6e:2x2x1
jax: 0.10.0
libtpu: 0.0.40
codegen_flags: <defaults>
</compile_context>

<pallas_src>
import functools
import numpy as np
import jax
import jax.numpy as jnp
from jax import lax
from jax.experimental import pallas as pl
from jax.experimental.pallas import tpu as pltpu

# ----------------------------- small synthetic config -----------------------------
CONV_CFG = [(24, 10, 5), (24, 3, 2), (24, 3, 2), (24, 3, 2),
            (24, 3, 2), (24, 2, 2), (24, 2, 2)]   # (dim, kernel, stride) => x320 downsample
EMBED = 32
N_HEADS = 4
FFN = 64
N_LAYERS = 2
POS_K = 4      # conv_pos kernel (even -> exercises SamePad trim)
POS_G = 4      # conv_pos_groups
LN_EPS = 1e-5
_SQRT1_2 = 0.7071067811865476
NEG_BIG = -1e30

_PARALLEL_B = pltpu.CompilerParams(dimension_semantics=("parallel",))
_VMEM = pl.BlockSpec(memory_space=pltpu.MemorySpace.VMEM)


# --------------------------------- in-kernel helpers --------------------------------
def _gelu(x):
    # exact (erf) GELU, matches torch.nn.GELU()
    return 0.5 * x * (1.0 + lax.erf(x * _SQRT1_2))


def _ln(x, g, b, eps):
    mean = jnp.mean(x, axis=-1, keepdims=True)
    var = jnp.mean(jnp.square(x - mean), axis=-1, keepdims=True)
    return (x - mean) * lax.rsqrt(var + eps) * g + b


def _dot(a, b):
    # bf16 MXU operands, f32 accumulation
    return jnp.dot(a.astype(jnp.bfloat16), b.astype(jnp.bfloat16),
                   preferred_element_type=jnp.float32)


# --------------------------------- Pallas kernels ---------------------------------
def _wav_ln_kernel(x_ref, m_ref, o_ref, *, eps):
    # F.layer_norm(wav, wav.shape) over valid samples only; padding stays 0.
    x = x_ref[...]
    m = m_ref[...]
    cnt = jnp.maximum(jnp.sum(m, axis=-1, keepdims=True), 1.0)
    mean = jnp.sum(x * m, axis=-1, keepdims=True) / cnt
    var = jnp.sum(jnp.square(x - mean) * m, axis=-1, keepdims=True) / cnt
    o_ref[...] = (x - mean) * lax.rsqrt(var + eps) * m


def masked_wav_layernorm(wav, valid_mask, eps=LN_EPS):
    return pl.pallas_call(
        functools.partial(_wav_ln_kernel, eps=eps),
        out_shape=jax.ShapeDtypeStruct(wav.shape, jnp.float32),
        in_specs=[_VMEM, _VMEM],
        out_specs=_VMEM,
    )(wav.astype(jnp.float32), valid_mask.astype(jnp.float32))


def _conv_patches(xp, k, stride, t_out):
    # xp: (stride, rows, C_in) phase-split view, xp[ph, r, c] == x[r*stride + ph, c].
    taps = []
    for j in range(k):
        q, ph = divmod(j, stride)
        taps.append(xp[ph, q:q + t_out, :])            # (t_out, C_in), contiguous slice
    return jnp.concatenate(taps, axis=-1)               # (t_out, k*C_in), tap-major rows


def _conv_gelu_kernel(xp_ref, w_ref, o_ref, *, k, stride, t_out):
    patches = _conv_patches(xp_ref[...], k, stride, t_out)
    o_ref[...] = _gelu(_dot(patches, w_ref[...]))


def _conv_gn_gelu_kernel(xp_ref, w_ref, g_ref, b_ref, o_ref, *, k, stride, t_out, eps):
    patches = _conv_patches(xp_ref[...], k, stride, t_out)
    y = _dot(patches, w_ref[...])                        # (t_out, C_out)
    # GroupNorm(dim, dim): per-channel normalization over time.
    mean = jnp.mean(y, axis=0, keepdims=True)
    var = jnp.mean(jnp.square(y - mean), axis=0, keepdims=True)
    y = (y - mean) * lax.rsqrt(var + eps) * g_ref[...] + b_ref[...]
    o_ref[...] = _gelu(y)


def conv_layer(x, w_mat, k, stride, gn=None):
    """x: (B, T_in, C_in) f32; w_mat: (k*C_in, C_out) bf16 (tap-major rows)."""
    b, t_in, c_in = x.shape
    c_out = w_mat.shape[1]
    t_out = (t_in - k) // stride + 1
    rows = (k - 1) // stride + t_out
    tp = rows * stride
    xs = x[:, :tp, :] if tp <= t_in else jnp.pad(x, ((0, 0), (0, tp - t_in), (0, 0)))
    # Phase-split view so the kernel only needs contiguous static slices:
    xp = jnp.transpose(xs.reshape(b, rows, stride, c_in), (0, 2, 1, 3))  # (B, s, rows, C)

    in_specs = [pl.BlockSpec((None, stride, rows, c_in), lambda i: (i, 0, 0, 0)),
                pl.BlockSpec((k * c_in, c_out), lambda i: (0, 0))]
    args = [xp, w_mat]
    if gn is None:
        kern = functools.partial(_conv_gelu_kernel, k=k, stride=stride, t_out=t_out)
    else:
        kern = functools.partial(_conv_gn_gelu_kernel, k=k, stride=stride,
                                 t_out=t_out, eps=LN_EPS)
        in_specs += [pl.BlockSpec((1, c_out), lambda i: (0, 0))] * 2
        args += [gn[0], gn[1]]
    return pl.pallas_call(
        kern,
        out_shape=jax.ShapeDtypeStruct((b, t_out, c_out), jnp.float32),
        grid=(b,),
        in_specs=in_specs,
        out_specs=pl.BlockSpec((None, t_out, c_out), lambda i: (i, 0, 0)),
        compiler_params=_PARALLEL_B,
    )(*args)


def _feat_ln_proj_kernel(x_ref, g_ref, b_ref, w_ref, pb_ref, o_ref, *, eps):
    x = _ln(x_ref[...], g_ref[...], b_ref[...], eps)
    o_ref[...] = _dot(x, w_ref[...]) + pb_ref[...]


def feat_ln_proj(feats, p):
    b, tf, c = feats.shape
    return pl.pallas_call(
        functools.partial(_feat_ln_proj_kernel, eps=LN_EPS),
        out_shape=jax.ShapeDtypeStruct((b, tf, EMBED), jnp.float32),
        grid=(b,),
        in_specs=[pl.BlockSpec((None, tf, c), lambda i: (i, 0, 0)),
                  pl.BlockSpec((1, c), lambda i: (0, 0)),
                  pl.BlockSpec((1, c), lambda i: (0, 0)),
                  pl.BlockSpec((c, EMBED), lambda i: (0, 0)),
                  pl.BlockSpec((1, EMBED), lambda i: (0, 0))],
        out_specs=pl.BlockSpec((None, tf, EMBED), lambda i: (i, 0, 0)),
        compiler_params=_PARALLEL_B,
    )(feats, p['feat_ln_g'], p['feat_ln_b'], p['proj_w'], p['proj_b'])


def _encoder_pre_kernel(x_ref, pm_ref, wg_ref, pb_ref, g_ref, b_ref, o_ref, *, t, eps):
    # x[padding_mask] = 0 ; grouped pos_conv ; SamePad ; GELU ; residual ; LayerNorm.
    x = x_ref[...] * (1.0 - pm_ref[...])                 # (T, E)
    pad = POS_K // 2
    eg = EMBED // POS_G
    z = jnp.zeros((pad, EMBED), jnp.float32)
    xp = jnp.concatenate([z, x, z], axis=0)              # (T + 2*pad, E)
    wg_all = wg_ref[...]                                 # (G, K*eg, eg) bf16
    outs = []
    for g in range(POS_G):
        xg = xp[:, g * eg:(g + 1) * eg]                  # (T + 2*pad, eg)
        taps = [xg[j:j + t, :] for j in range(POS_K)]    # SamePad: keep outputs 0..T-1
        pg = jnp.concatenate(taps, axis=-1)              # (T, K*eg)
        outs.append(_dot(pg, wg_all[g]))                 # true grouped matmul, no zeros
    y = _gelu(jnp.concatenate(outs, axis=-1) + pb_ref[...])
    o_ref[...] = _ln(x + y, g_ref[...], b_ref[...], eps)


def encoder_pre(x, padmask_col, p):
    b, t, e = x.shape
    eg = EMBED // POS_G
    return pl.pallas_call(
        functools.partial(_encoder_pre_kernel, t=t, eps=LN_EPS),
        out_shape=jax.ShapeDtypeStruct((b, t, e), jnp.float32),
        grid=(b,),
        in_specs=[pl.BlockSpec((None, t, e), lambda i: (i, 0, 0)),
                  pl.BlockSpec((None, t, 1), lambda i: (i, 0, 0)),
                  pl.BlockSpec((POS_G, POS_K * eg, eg), lambda i: (0, 0, 0)),
                  pl.BlockSpec((1, e), lambda i: (0, 0)),
                  pl.BlockSpec((1, e), lambda i: (0, 0)),
                  pl.BlockSpec((1, e), lambda i: (0, 0))],
        out_specs=pl.BlockSpec((None, t, e), lambda i: (i, 0, 0)),
        compiler_params=_PARALLEL_B,
    )(x, padmask_col, p['pos_w'], p['pos_b'], p['enc_ln_g'], p['enc_ln_b'])


def _encoder_layer_kernel(x_ref, pm_ref, wqkv_ref, bqkv_ref, wo_ref, bo_ref,
                          ln1g_ref, ln1b_ref, w1_ref, b1_ref, w2_ref, b2_ref,
                          ln2g_ref, ln2b_ref, o_ref, *, n_heads, eps):
    # Whole post-LN TransformerSentenceEncoderLayer fused into one kernel.
    x = x_ref[...]                                       # (T, E) f32
    _, e = x.shape
    dh = e // n_heads
    key_bias = pm_ref[...] * NEG_BIG                     # (1, T) broadcasts over queries

    qkv = _dot(x, wqkv_ref[...]) + bqkv_ref[...]         # (T, 3E); q pre-scaled via Wq
    q, k, v = qkv[:, :e], qkv[:, e:2 * e], qkv[:, 2 * e:]

    heads = []
    for h in range(n_heads):
        sl = slice(h * dh, (h + 1) * dh)
        qh = q[:, sl].astype(jnp.bfloat16)
        kh = k[:, sl].astype(jnp.bfloat16)
        vh = v[:, sl].astype(jnp.bfloat16)
        s = jnp.einsum('qd,kd->qk', qh, kh, preferred_element_type=jnp.float32)
        s = s + key_bias                                 # key padding mask, in-kernel bcast
        m = jnp.max(s, axis=-1, keepdims=True)
        ex = jnp.exp(s - m)
        pr = ex * pl.reciprocal(jnp.sum(ex, axis=-1, keepdims=True), approx=True)
        heads.append(_dot(pr, vh))                       # (T, dh)
    attn = jnp.concatenate(heads, axis=-1)               # (T, E)

    o = _dot(attn, wo_ref[...]) + bo_ref[...]
    x = _ln(x + o, ln1g_ref[...], ln1b_ref[...], eps)    # residual + LN1 fused
    h1 = _gelu(_dot(x, w1_ref[...]) + b1_ref[...])
    h2 = _dot(h1, w2_ref[...]) + b2_ref[...]
    o_ref[...] = _ln(x + h2, ln2g_ref[...], ln2b_ref[...], eps)   # residual + LN2 fused


def encoder_layer(x, padmask_row, lp):
    b, t, e = x.shape

    def w2(shape):
        return pl.BlockSpec(shape, lambda i: (0, 0))

    return pl.pallas_call(
        functools.partial(_encoder_layer_kernel, n_heads=N_HEADS, eps=LN_EPS),
        out_shape=jax.ShapeDtypeStruct((b, t, e), jnp.float32),
        grid=(b,),
        in_specs=[pl.BlockSpec((None, t, e), lambda i: (i, 0, 0)),
                  pl.BlockSpec((None, 1, t), lambda i: (i, 0, 0)),
                  w2((e, 3 * e)), w2((1, 3 * e)),
                  w2((e, e)), w2((1, e)),
                  w2((1, e)), w2((1, e)),
                  w2((e, FFN)), w2((1, FFN)),
                  w2((FFN, e)), w2((1, e)),
                  w2((1, e)), w2((1, e))],
        out_specs=pl.BlockSpec((None, t, e), lambda i: (i, 0, 0)),
        compiler_params=_PARALLEL_B,
    )(x, padmask_row, lp['wqkv'], lp['bqkv'], lp['wo'], lp['bo'],
      lp['ln1_g'], lp['ln1_b'], lp['w1'], lp['b1'], lp['w2'], lp['b2'],
      lp['ln2_g'], lp['ln2_b'])


# ------------------------------------ model glue ------------------------------------
def feature_extractor(wav_n, p):
    """ConvFeatureExtractionModel, mode='default', conv_bias=False."""
    x = wav_n[:, :, None]                                # (B, T, 1)
    for i, (w_mat, (_c, k, s)) in enumerate(zip(p['conv_w'], CONV_CFG)):
        gn = (p['gn_g'], p['gn_b']) if i == 0 else None
        x = conv_layer(x, w_mat, k, s, gn=gn)
    return x                                             # (B, Tf, C)


def upstream_forward(wavs, wav_lengths, p):
    """Equivalent of UpstreamExpert.forward + UpstreamBase hook collection."""
    b, t = wavs.shape
    valid = jnp.arange(t)[None, :] < wav_lengths[:, None]
    wav_padding_mask = ~valid

    # cfg.normalize: F.layer_norm(wav, wav.shape) per (unpadded) wav
    wavs_n = masked_wav_layernorm(wavs, valid)

    feats = feature_extractor(wavs_n, p)                 # (B, Tf, C)
    tf = feats.shape[1]
    feats = feat_ln_proj(feats, p)                       # (B, Tf, E)

    # forward_padding_mask
    extra = t % tf
    wpm = wav_padding_mask[:, :t - extra] if extra > 0 else wav_padding_mask
    feat_padding_mask = jnp.all(wpm.reshape(b, tf, -1), axis=-1)     # (B, Tf) bool
    pm_f = feat_padding_mask.astype(jnp.float32)
    pm_col = pm_f[:, :, None]                            # (B, Tf, 1) frame-wise broadcast
    pm_row = pm_f[:, None, :]                            # (B, 1, Tf) key-axis broadcast

    x = encoder_pre(feats, pm_col, p)

    layer_inputs = []
    for lp in p['layers']:
        layer_inputs.append(x)     # hook: input[0].transpose(0, 1) -> (B, T, E)
        x = encoder_layer(x, pm_row, lp)

    hidden_states = tuple(layer_inputs) + (x,)
    result = {
        '_hidden_states_info': tuple(
            [f'self.model.encoder.layers[{i}]' for i in range(N_LAYERS)]
            + ['self.model.encoder']),
        'hidden_states': hidden_states,
        'last_hidden_state': x,
    }
    for i, hs in enumerate(hidden_states):
        result[f'hidden_state_{i}'] = hs
    return result


# --------------------------------- parameter init ---------------------------------
def init_params(seed=0):
    base = jax.random.PRNGKey(seed)
    ctr = [0]

    def nrm(shape, fan_in):
        ctr[0] += 1
        return np.asarray(jax.random.normal(jax.random.fold_in(base, ctr[0]),
                                            shape, jnp.float32)) / np.sqrt(fan_in)

    p = {}
    conv_w, cin = [], 1
    for (cout, k, _s) in CONV_CFG:
        w = nrm((cout, cin, k), cin * k)                             # torch (Cout, Cin, K)
        w_mat = np.transpose(w, (2, 1, 0)).reshape(k * cin, cout)    # tap-major rows
        conv_w.append(jnp.asarray(w_mat, jnp.bfloat16))
        cin = cout
    p['conv_w'] = conv_w
    c0, c_last = CONV_CFG[0][0], CONV_CFG[-1][0]
    p['gn_g'] = jnp.ones((1, c0), jnp.float32)
    p['gn_b'] = jnp.zeros((1, c0), jnp.float32)
    p['feat_ln_g'] = jnp.ones((1, c_last), jnp.float32)
    p['feat_ln_b'] = jnp.zeros((1, c_last), jnp.float32)
    p['proj_w'] = jnp.asarray(nrm((c_last, EMBED), c_last), jnp.bfloat16)
    p['proj_b'] = jnp.zeros((1, EMBED), jnp.float32)

    # grouped conv positional embedding: torch weight (E, E//G, K) -> (G, K*eg, eg)
    eg = EMBED // POS_G
    pos_w = nrm((EMBED, eg, POS_K), eg * POS_K)
    wg = np.zeros((POS_G, POS_K * eg, eg), np.float32)
    for g in range(POS_G):
        for col in range(eg):
            co = g * eg + col
            for j in range(POS_K):
                wg[g, j * eg:(j + 1) * eg, col] = pos_w[co, :, j]
    p['pos_w'] = jnp.asarray(wg, jnp.bfloat16)
    p['pos_b'] = jnp.zeros((1, EMBED), jnp.float32)
    p['enc_ln_g'] = jnp.ones((1, EMBED), jnp.float32)
    p['enc_ln_b'] = jnp.zeros((1, EMBED), jnp.float32)

    scale = (EMBED // N_HEADS) ** -0.5
    layers = []
    for _ in range(N_LAYERS):
        wq = nrm((EMBED, EMBED), EMBED) * scale          # fold 1/sqrt(dh) into Wq (and bq)
        wk = nrm((EMBED, EMBED), EMBED)
        wv = nrm((EMBED, EMBED), EMBED)
        layers.append({
            'wqkv': jnp.asarray(np.concatenate([wq, wk, wv], axis=1), jnp.bfloat16),
            'bqkv': jnp.zeros((1, 3 * EMBED), jnp.float32),
            'wo': jnp.asarray(nrm((EMBED, EMBED), EMBED), jnp.bfloat16),
            'bo': jnp.zeros((1, EMBED), jnp.float32),
            'ln1_g': jnp.ones((1, EMBED), jnp.float32),
            'ln1_b': jnp.zeros((1, EMBED), jnp.float32),
            'w1': jnp.asarray(nrm((EMBED, FFN), EMBED), jnp.bfloat16),
            'b1': jnp.zeros((1, FFN), jnp.float32),
            'w2': jnp.asarray(nrm((FFN, EMBED), FFN), jnp.bfloat16),
            'b2': jnp.zeros((1, EMBED), jnp.float32),
            'ln2_g': jnp.ones((1, EMBED), jnp.float32),
            'ln2_b': jnp.zeros((1, EMBED), jnp.float32),
        })
    p['layers'] = layers
    return p


# --------------------------------------- main --------------------------------------
if __name__ == "__main__":
    key = jax.random.PRNGKey(0)
    B, T = 2, 1600                                    # 1600 samples / 320 -> 4 frames
    wav_lengths = jnp.array([1600, 1200], dtype=jnp.int32)
    wavs = jax.random.normal(key, (B, T), jnp.float32)
    valid = jnp.arange(T)[None, :] < wav_lengths[:, None]
    wavs = jnp.where(valid, wavs, 0.0)                # emulate pad_sequence zero padding

    params = init_params(0)
    result = upstream_forward(wavs, wav_lengths, params)

    last = jax.block_until_ready(result['last_hidden_state'])
    assert last.shape == (B, 4, EMBED), last.shape
    assert len(result['hidden_states']) == N_LAYERS + 1
    assert bool(jnp.all(jnp.isfinite(last)))
    print("KERNEL_OK")
</pallas_src>

<mosaic_0001>
module attributes {stable_mosaic.version = 11 : i64} {
  func.func @_wav_ln_kernel(%arg0: memref<2x1600xf32, #tpu.memory_space<vmem>>, %arg1: memref<2x1600xf32, #tpu.memory_space<vmem>>, %arg2: memref<2x1600xf32, #tpu.memory_space<vmem>>) attributes {dimension_semantics = [], scalar_prefetch = 0 : i64, scratch_operands = 0 : i64, tpu.core_type = #tpu.core_type<tc>} {
    %c0 = arith.constant 0 : index
    %c0_0 = arith.constant 0 : index
    %0 = vector.load %arg0[%c0, %c0_0] : memref<2x1600xf32, #tpu.memory_space<vmem>>, vector<2x1600xf32>
    %c0_1 = arith.constant 0 : index
    %c0_2 = arith.constant 0 : index
    %1 = vector.load %arg1[%c0_1, %c0_2] : memref<2x1600xf32, #tpu.memory_space<vmem>>, vector<2x1600xf32>
    %cst = arith.constant dense<0.000000e+00> : vector<2xf32>
    %2 = vector.multi_reduction <add>, %1, %cst [1] : vector<2x1600xf32> to vector<2xf32>
    %3 = vector.shape_cast %2 : vector<2xf32> to vector<2x1xf32>
    %cst_3 = arith.constant 1.000000e+00 : f32
    %4 = vector.broadcast %cst_3 : f32 to vector<2x1xf32>
    %5 = arith.maximumf %3, %4 : vector<2x1xf32>
    %6 = arith.mulf %0, %1 : vector<2x1600xf32>
    %cst_4 = arith.constant dense<0.000000e+00> : vector<2xf32>
    %7 = vector.multi_reduction <add>, %6, %cst_4 [1] : vector<2x1600xf32> to vector<2xf32>
    %8 = vector.shape_cast %7 : vector<2xf32> to vector<2x1xf32>
    %9 = arith.divf %8, %5 : vector<2x1xf32>
    %10 = vector.broadcast %9 : vector<2x1xf32> to vector<2x1600xf32>
    %11 = arith.subf %0, %10 : vector<2x1600xf32>
    %12 = arith.mulf %11, %11 : vector<2x1600xf32>
    %13 = arith.mulf %12, %1 : vector<2x1600xf32>
    %cst_5 = arith.constant dense<0.000000e+00> : vector<2xf32>
    %14 = vector.multi_reduction <add>, %13, %cst_5 [1] : vector<2x1600xf32> to vector<2xf32>
    %15 = vector.shape_cast %14 : vector<2xf32> to vector<2x1xf32>
    %16 = arith.divf %15, %5 : vector<2x1xf32>
    %17 = vector.broadcast %9 : vector<2x1xf32> to vector<2x1600xf32>
    %18 = arith.subf %0, %17 : vector<2x1600xf32>
    %cst_6 = arith.constant 9.99999974E-6 : f32
    %19 = vector.broadcast %cst_6 : f32 to vector<2x1xf32>
    %20 = arith.addf %16, %19 : vector<2x1xf32>
    %21 = math.rsqrt %20 : vector<2x1xf32>
    %22 = vector.broadcast %21 : vector<2x1xf32> to vector<2x1600xf32>
    %23 = arith.mulf %18, %22 : vector<2x1600xf32>
    %24 = arith.mulf %23, %1 : vector<2x1600xf32>
    %c0_7 = arith.constant 0 : index
    %c0_8 = arith.constant 0 : index
    %25 = vector.load %arg2[%c0_7, %c0_8] : memref<2x1600xf32, #tpu.memory_space<vmem>>, vector<2x1600xf32>
    tpu.vector_store %arg2[%c0_7, %c0_8], %24 {strides = array<i32>} : memref<2x1600xf32, #tpu.memory_space<vmem>>, vector<2x1600xf32>,
    return
  }
}

</mosaic_0001>

<bundles_post_ra>
// kernel: tpu_custom_call.1
= control target key start
LH: loop header
LB: loop body
LE: loop exit
PB: predicated region body
PF: predicated region fallthrough
CT: control target
= control target key end

     0   :  { %7 = vsyncpa [#allocation3], 0  ;;  %s640_s0 = inlined_call_operand.hbm [shape: f32[2,1600], index: 0, kind: input, shape index: {}]   ;;  %s641_s1 = inlined_call_operand.hbm [shape: f32[2,1600], index: 1, kind: input, shape index: {}]   ;;  %s642_s2 = inlined_call_operand.hbm [shape: f32[2,1600], index: 2, kind: output, shape index: {}]  }
   0x1   :  { %8 = vsyncpa [#allocation6], 0 }
   0x2   :  { %9 = vsyncpa [#allocation4], 0  ;;  %s498_s9 = smov [#allocation2]   ;;  %s499_s11 = smov [#allocation5]  }
   0x3   :  { %s16_s10 = sshll.u32 %s498_s9, 4  ;;  %s26_s12 = sshll.u32 %s499_s11, 4  ;;  %s17_s10 = int_to_ptr.vmem [resolvable:$true] %s16_s10  ;;  %s27_s12 = int_to_ptr.vmem [resolvable:$true] %s26_s12 }
   0x4   :  { %s440_s13 = scalar_lea.vmem %s17_s10, 416  ;;  %p445_p1 = scmp.lt.s32.totalorder %s17_s10, %s17_s10 }
   0x5   :  { %p441_p0 = scmp.ne.s32.totalorder %s17_s10, %s440_s13  ;;  %p446_p2 = scmp.lt.s32.totalorder %s440_s13, %s440_s13 }
   0x7   :  { %p447_p3 = por %p446_p2, %p445_p1 }
   0x9   :  { %p448_p4 = pnand %p447_p3, %p441_p0 }
   0xb   :  { %451 = shalt.err (!%p448_p4)
}
   0xc   :  { %19 = dma.hbm_to_vmem [thread:$0]  %s640_s0, 416, %s17_s10, [#allocation3]  }
   0xd   :  { %s460_s16 = scalar_lea.vmem %s27_s12, 416  ;;  %p465_p6 = scmp.lt.s32.totalorder %s27_s12, %s27_s12 }
   0xe   :  { %p461_p5 = scmp.ne.s32.totalorder %s27_s12, %s460_s16  ;;  %p466_p7 = scmp.lt.s32.totalorder %s460_s16, %s460_s16 }
  0x10   :  { %p467_p8 = por %p466_p7, %p465_p6 }
  0x12   :  { %p468_p9 = pnand %p467_p8, %p461_p5 }
  0x14   :  { %471 = shalt.err (!%p468_p9)
}
  0x15   :  { %29 = dma.hbm_to_vmem [thread:$0]  %s641_s1, 416, %s27_s12, [#allocation6]  }
  0x16   :  { %492 = dma.done.wait [#allocation3], 416  }
  0x17   :  { %493 = vsyncadd [#allocation3], 4294966880 }
  0x18   :  { %494 = dma.done.wait [#allocation6], 416  }
  0x19   :  { %495 = vsyncadd [#allocation6], 4294966880  ;;  %v52_v0 = vlaneseq  ;;  %v500_v1 = vmov 1983009808   ;;  %v529_v6 = vld [vmem:[#allocation5] sm:$0xff]  ;;  %v531_v7 = vld [vmem:[#allocation5 + $0x8] sm:$0xff] }
  0x1a   :  { %v50_v2 = vunpack.c.l.s4 %v500_v1  ;;  %v48_v8 = vcombine.high %v529_v6, %v529_v6  ;;  %vm119_vm0 = vcmask 1041408   ;;  %v65_v12 = vcombine.high %v531_v7, %v531_v7  ;;  %v542_v14 = vld [vmem:[#allocation2] sm:$0xff]  ;;  %v547_v20 = vld [vmem:[#allocation2 + $0x8] sm:$0xff]  ;;  %v565_v38 = vld [vmem:[#allocation2 + $0x10] sm:$0xff]  ;;  %s502_s0 = smov [#allocation7]  }
  0x1b   :  { %v524_v3 = vshrl.u32 %v52_v0, 7  ;;  %v149_v21 = vmul.f32 %v529_v6, %v542_v14  ;;  %v551_v22 = vld [vmem:[#allocation5 + $0x10] sm:$0xff]  ;;  %v150_v29 = vmul.f32 %v531_v7, %v547_v20  ;;  %v579_v59 = vld [vmem:[#allocation5 + $0x18] sm:$0x3]  ;;  %vm143_vm1 = vcmask 517120   ;;  %s410_s1 = sshll.u32 %s502_s0, 4  ;;  %s411_s1 = int_to_ptr.vmem [resolvable:$true] %s410_s1 }
  0x1c   :  { %v51_v4 = vunpack.c.0.s8 %v50_v2  ;;  %v82_v27 = vcombine.high %v551_v22, %v551_v22  ;;  %v151_v50 = vmul.f32 %v551_v22, %v565_v38  ;;  %s472_s19 = scalar_lea.vmem %s411_s1, 416  ;;  %p477_p11 = scmp.lt.s32.totalorder %s411_s1, %s411_s1 }
  0x1d   :  { %v157_v30 = vcombine.high %v149_v21, %v149_v21  ;;  %v174_v40 = vcombine.high %v150_v29, %v150_v29  ;;  %p473_p10 = scmp.ne.s32.totalorder %s411_s1, %s472_s19  ;;  %p478_p12 = scmp.lt.s32.totalorder %s472_s19, %s472_s19 }
  0x1e   :  { %v527_v5 = vsub.s32 %v51_v4, %v524_v3  ;;  %v191_v0 = vcombine.high %v151_v50, %v151_v50 }
  0x1f   :  { %p479_p13 = por %p478_p12, %p477_p11 }
  0x20   :  { %v55_v9 = vrot.slane %v529_v6, %v527_v5  ;;  %v62_v10 = vrot.slane %v48_v8, %v527_v5  ;;  %v72_v13 = vrot.slane %v531_v7, %v527_v5  ;;  %v79_v23 = vrot.slane %v65_v12, %v527_v5 }
  0x21   :  { %v89_v31 = vrot.slane %v551_v22, %v527_v5  ;;  %v164_v33 = vrot.slane %v149_v21, %v527_v5  ;;  %v171_v36 = vrot.slane %v157_v30, %v527_v5  ;;  %v181_v41 = vrot.slane %v150_v29, %v527_v5  ;;  %p480_p0 = pnand %p479_p13, %p473_p10 }
  0x22   :  { %v63_v11 = vcombine.high %v55_v9, %v55_v9  ;;  %v120_v15 = vsel %vm119_vm0, %v55_v9, 0.0  ;;  %v64_v16 = vcombine.high %v62_v10, %v62_v10  ;;  %v123_v18 = vsel %vm119_vm0, %v62_v10, 0.0 }
  0x23   :  { %v80_v24 = vcombine.high %v72_v13, %v72_v13  ;;  %v127_v28 = vsel %vm119_vm0, %v72_v13, 0.0  ;;  %v81_v34 = vcombine.high %v79_v23, %v79_v23  ;;  %v172_v39 = vcombine.high %v164_v33, %v164_v33 }
  0x24   :  { %v121_v17 = vsel %vm119_vm0, %v63_v11, 0.0  ;;  %v125_v25 = vsel %vm119_vm0, %v64_v16, 0.0  ;;  %v96_v42 = vrot.slane %v82_v27, %v527_v5  ;;  %v131_v43 = vsel %vm119_vm0, %v79_v23, 0.0 }
  0x25   :  { %v122_v19 = vadd.f32 %v121_v17, %v120_v15  ;;  %v129_v35 = vsel %vm119_vm0, %v80_v24, 0.0  ;;  %v173_v44 = vcombine.high %v171_v36, %v171_v36  ;;  %v97_v45 = vcombine.high %v89_v31, %v89_v31  ;;  %v39_v17 = vld [vmem:[#allocation2 + $0x18] sm:$0x3] }
  0x26   :  { %v228_v47 = vsel %vm119_vm0, %v164_v33, 0.0  ;;  %v229_v48 = vsel %vm119_vm0, %v172_v39, 0.0  ;;  %v133_v49 = vsel %vm119_vm0, %v81_v34, 0.0  ;;  %v231_v52 = vsel %vm119_vm0, %v171_v36, 0.0 }
  0x27   :  { %v124_v26 = vadd.f32 %v123_v18, %v122_v19  ;;  %v230_v51 = vadd.f32 %v229_v48, %v228_v47  ;;  %v188_v54 = vrot.slane %v174_v40, %v527_v5  ;;  %v189_v55 = vcombine.high %v181_v41, %v181_v41 }
  0x28   :  { %v233_v56 = vsel %vm119_vm0, %v173_v44, 0.0  ;;  %v135_v57 = vsel %vm119_vm0, %v89_v31, 0.0  ;;  %v235_v61 = vsel %vm119_vm0, %v181_v41, 0.0  ;;  %v98_v62 = vcombine.high %v96_v42, %v96_v42 }
  0x29   :  { %v126_v32 = vadd.f32 %v125_v25, %v124_v26  ;;  %v232_v58 = vadd.f32 %v231_v52, %v230_v51  ;;  %v137_v63 = vsel %vm119_vm0, %v97_v45, 0.0  ;;  %v190_v4 = vcombine.high %v188_v54, %v188_v54 }
  0x2a   :  { %v198_v8 = vrot.slane %v151_v50, %v527_v5  ;;  %v237_v9 = vsel %vm119_vm0, %v189_v55, 0.0  ;;  %v105_v10 = vrot.slane %v579_v59, %v527_v5  ;;  %v139_v11 = vsel %vm119_vm0, %v96_v42, 0.0 }
  0x2b   :  { %v128_v37 = vadd.f32 %v127_v28, %v126_v32  ;;  %v234_v1 = vadd.f32 %v233_v56, %v232_v58  ;;  %v239_v15 = vsel %vm119_vm0, %v188_v54, 0.0  ;;  %v141_v16 = vsel %vm119_vm0, %v98_v62, 0.0 }
  0x2c   :  { %v205_v21 = vrot.slane %v191_v0, %v527_v5  ;;  %v206_v23 = vcombine.high %v198_v8, %v198_v8  ;;  %v241_v24 = vsel %vm119_vm0, %v190_v4, 0.0  ;;  %v144_v25 = vsel %vm143_vm1, %v105_v10, 0.0 }
  0x2d   :  { %v130_v46 = vadd.f32 %v129_v35, %v128_v37  ;;  %v236_v12 = vadd.f32 %v235_v61, %v234_v1  ;;  %v152_v28 = vmul.f32 %v579_v59, %v39_v17  ;;  %v243_v29 = vsel %vm119_vm0, %v198_v8, 0.0 }
  0x2e   :  { %v207_v32 = vcombine.high %v205_v21, %v205_v21  ;;  %v245_v33 = vsel %vm119_vm0, %v206_v23, 0.0  ;;  %v247_v36 = vsel %vm119_vm0, %v205_v21, 0.0 }
  0x2f   :  { %v132_v53 = vadd.f32 %v131_v43, %v130_v46  ;;  %v238_v18 = vadd.f32 %v237_v9, %v236_v12  ;;  %v214_v35 = vrot.slane %v152_v28, %v527_v5  ;;  %v501_v46 = vmov 269488144  }
  0x30   :  { %v249_v39 = vsel %vm119_vm0, %v207_v32, 0.0  ;;  %v259_v47 = vunpack.c.l.s4 %v501_v46 }
  0x31   :  { %v134_v60 = vadd.f32 %v133_v49, %v132_v53  ;;  %v240_v26 = vadd.f32 %v239_v15, %v238_v18  ;;  %v251_v41 = vsel %vm143_vm1, %v214_v35, 0.0 }
  0x32   :  { %v260_v48 = vunpack.c.0.s8 %v259_v47 }
  0x33   :  { %v136_v2 = vadd.f32 %v135_v57, %v134_v60  ;;  %v242_v30 = vadd.f32 %v241_v24, %v240_v26 }
  0x34   :  { %v601_v50 = vsub.s32 %v260_v48, %v524_v3 }
  0x35   :  { %v138_v13 = vadd.f32 %v137_v63, %v136_v2  ;;  %v244_v34 = vadd.f32 %v243_v29, %v242_v30 }
  0x37   :  { %v140_v19 = vadd.f32 %v139_v11, %v138_v13  ;;  %v246_v37 = vadd.f32 %v245_v33, %v244_v34 }
  0x39   :  { %v142_v27 = vadd.f32 %v141_v16, %v140_v19  ;;  %v248_v40 = vadd.f32 %v247_v36, %v246_v37 }
  0x3b   :  { %v145_v31 = vadd.f32 %v144_v25, %v142_v27  ;;  %v250_v42 = vadd.f32 %v249_v39, %v248_v40 }
  0x3d   :  { %146 = vadd.xlane.f32.xlu0 %v145_v31  ;;  %v252_v43 = vadd.f32 %v251_v41, %v250_v42 }
  0x41   :  { %253 = vadd.xlane.f32.xlu0 %v252_v43 }
  0xc6   :  { %v147_v44 = vpop.xlane.xlu0 %146 }
  0xc7   :  { %v148_v45 = vmax.f32 %v147_v44, 1.0 }
  0xc9   :  { %428 = vrcp.f32 %v148_v45 }
  0xca   :  { %v254_v49 = vpop.xlane.xlu0 %253 }
  0xd6   :  { %v429_v51 = vpop.eup %428 }
  0xd7   :  { %v256_v52 = vmul.f32 %v429_v51, %v254_v49 }
  0xd9   :  { %v264_v53 = vrot.slane %v256_v52, %v601_v50 }
  0xdb   :  { %v266_v54 = vsub.f32 %v542_v14, %v264_v53  ;;  %v267_v55 = vsub.f32 %v547_v20, %v264_v53  ;;  %v268_v60 = vsub.f32 %v565_v38, %v264_v53  ;;  %v269_v18 = vsub.f32 %v39_v17, %v264_v53 }
  0xdd   :  { %v270_v56 = vmul.f32 %v266_v54, %v266_v54  ;;  %v271_v57 = vmul.f32 %v267_v55, %v267_v55  ;;  %v272_v1 = vmul.f32 %v268_v60, %v268_v60  ;;  %v273_v28 = vmul.f32 %v269_v18, %v269_v18 }
  0xdf   :  { %v274_v58 = vmul.f32 %v270_v56, %v529_v6  ;;  %v275_v61 = vmul.f32 %v271_v57, %v531_v7  ;;  %v276_v11 = vmul.f32 %v272_v1, %v551_v22  ;;  %v277_v34 = vmul.f32 %v273_v28, %v579_v59 }
  0xe1   :  { %v282_v62 = vcombine.high %v274_v58, %v274_v58  ;;  %v289_v3 = vrot.slane %v274_v58, %v527_v5  ;;  %v299_v2 = vcombine.high %v275_v61, %v275_v61  ;;  %v306_v14 = vrot.slane %v275_v61, %v527_v5 }
  0xe2   :  { %v316_v24 = vcombine.high %v276_v11, %v276_v11  ;;  %v323_v25 = vrot.slane %v276_v11, %v527_v5  ;;  %v339_v41 = vrot.slane %v277_v34, %v527_v5 }
  0xe3   :  { %v296_v63 = vrot.slane %v282_v62, %v527_v5  ;;  %v297_v0 = vcombine.high %v289_v3, %v289_v3  ;;  %v353_v20 = vsel %vm119_vm0, %v289_v3, 0.0  ;;  %v313_v12 = vrot.slane %v299_v2, %v527_v5 }
  0xe4   :  { %v314_v13 = vcombine.high %v306_v14, %v306_v14  ;;  %v360_v19 = vsel %vm119_vm0, %v306_v14, 0.0  ;;  %v330_v31 = vrot.slane %v316_v24, %v527_v5  ;;  %v331_v32 = vcombine.high %v323_v25, %v323_v25 }
  0xe5   :  { %v298_v4 = vcombine.high %v296_v63, %v296_v63  ;;  %v354_v8 = vsel %vm119_vm0, %v297_v0, 0.0  ;;  %v356_v38 = vsel %vm119_vm0, %v296_v63, 0.0  ;;  %v315_v23 = vcombine.high %v313_v12, %v313_v12 }
  0xe6   :  { %v355_v9 = vadd.f32 %v354_v8, %v353_v20  ;;  %v362_v26 = vsel %vm119_vm0, %v314_v13, 0.0  ;;  %v364_v29 = vsel %vm119_vm0, %v313_v12, 0.0  ;;  %v368_v35 = vsel %vm119_vm0, %v323_v25, 0.0 }
  0xe7   :  { %v358_v15 = vsel %vm119_vm0, %v298_v4, 0.0  ;;  %v366_v33 = vsel %vm119_vm0, %v315_v23, 0.0  ;;  %v332_v37 = vcombine.high %v330_v31, %v330_v31  ;;  %v370_v39 = vsel %vm119_vm0, %v331_v32, 0.0 }
  0xe8   :  { %v357_v10 = vadd.f32 %v356_v38, %v355_v9  ;;  %v372_v42 = vsel %vm119_vm0, %v330_v31, 0.0  ;;  %v376_v46 = vsel %vm143_vm1, %v339_v41, 0.0 }
  0xe9   :  { %v374_v44 = vsel %vm119_vm0, %v332_v37, 0.0 }
  0xea   :  { %v359_v16 = vadd.f32 %v358_v15, %v357_v10 }
  0xec   :  { %v361_v21 = vadd.f32 %v360_v19, %v359_v16 }
  0xee   :  { %v363_v27 = vadd.f32 %v362_v26, %v361_v21 }
  0xf0   :  { %v365_v30 = vadd.f32 %v364_v29, %v363_v27 }
  0xf2   :  { %v367_v17 = vadd.f32 %v366_v33, %v365_v30 }
  0xf4   :  { %v369_v36 = vadd.f32 %v368_v35, %v367_v17 }
  0xf6   :  { %v371_v40 = vadd.f32 %v370_v39, %v369_v36 }
  0xf8   :  { %v373_v43 = vadd.f32 %v372_v42, %v371_v40 }
  0xfa   :  { %v375_v45 = vadd.f32 %v374_v44, %v373_v43 }
  0xfc   :  { %v377_v47 = vadd.f32 %v376_v46, %v375_v45 }
  0xfe   :  { %378 = vadd.xlane.f32.xlu1 %v377_v47 }
 0x187   :  { %v379_v48 = vpop.xlane.xlu1 %378 }
 0x188   :  { %v380_v49 = vmul.f32 %v429_v51, %v379_v48 }
 0x18a   :  { %v381_v52 = vadd.f32 1e-05, %v380_v49 }
 0x18c   :  { %430 = vrsqrt.f32 %v381_v52 }
 0x199   :  { %v431_v53 = vpop.eup %430 }
 0x19a   :  { %v390_v56 = vrot.slane %v431_v53, %v601_v50 }
 0x19c   :  { %v392_v5 = vmul.f32 %v390_v56, %v266_v54  ;;  %v393_v57 = vmul.f32 %v390_v56, %v267_v55  ;;  %v394_v58 = vmul.f32 %v390_v56, %v268_v60  ;;  %v395_v61 = vmul.f32 %v390_v56, %v269_v18 }
 0x19e   :  { %v396_v62 = vmul.f32 %v392_v5, %v529_v6  ;;  %v397_v3 = vmul.f32 %v393_v57, %v531_v7  ;;  %v398_v63 = vmul.f32 %v394_v58, %v551_v22  ;;  %v399_v0 = vmul.f32 %v395_v61, %v579_v59 }
 0x1a0   :  { %400 = vst [vmem:[#allocation7] sm:$0xff] %v396_v62  ;;  %401 = vst [vmem:[#allocation7 + $0x8] sm:$0xff] %v397_v3 }
 0x1a1   :  { %402 = vst [vmem:[#allocation7 + $0x10] sm:$0xff] %v398_v63  ;;  %403 = vst.msk [vmem:[#allocation7 + $0x18] sm:$0x3] %vm143_vm1, %v399_v0 }
 0x1a2   :  { %483 = shalt.err (!%p480_p0)
}
 0x1a3   :  { %413 = dma.vmem_to_hbm [thread:$0]  %s411_s1, 416, %s642_s2, [#allocation4]  }
 0x1a4   :  { %496 = dma.done.wait [#allocation4], 416  }
 0x1a5   :  { %497 = vsyncadd [#allocation4], 4294966880 }
 0x1a6   :  { %417 = vsyncpa [#allocation3], 1 }
 0x1a7   :  { %418 = vsyncpa [#allocation6], 1 }
 0x1a8   :  { %419 = vsyncpa [#allocation4], 1 }

</bundles_post_ra>
